<compile_context>
chip_gen: v7x
topology: tpu7x:2x2x1
jax: 0.10.0
libtpu: 0.0.40
codegen_flags: <defaults>
</compile_context>

<pallas_src>
import jax
import jax.numpy as jnp
from jax import lax
from jax.experimental import pallas as pl
from jax.experimental.pallas import tpu as pltpu


def mlp_kernel(x_ref, w1_ref, b1_ref, w2_ref, b2_ref, o_ref):
    """One batch tile.

    x_ref  : (TB, D_in) VMEM (bf16 or f32), batch-tiled
    w1_ref : (D_in, H)  VMEM, resident across the batch grid
    b1_ref : (1, H)     VMEM, resident
    w2_ref : (1, H)     VMEM, resident (second linear, pre-transposed row)
    b2_ref : (1, 1)     SMEM scalar
    o_ref  : (1, TB)    VMEM, lane-dense output row for this tile
    """
    # linear1 on the MXU, f32 accumulation.
    h = jnp.dot(x_ref[...], w1_ref[...], preferred_element_type=jnp.float32)
    # bias + ReLU in f32 on the VPU (works on v5e too: no bf16 VPU needed).
    h = jnp.maximum(h + b1_ref[...].astype(jnp.float32), 0.0)

    # linear2 (H -> 1), computed transposed: contract (1, H) with (TB, H) over
    # H -> (1, TB). The result is lane-dense, so the store below writes full
    # 128-lane vregs instead of tb/8 masked single-lane stores.
    y = lax.dot_general(
        w2_ref[...].astype(jnp.float32), h,
        dimension_numbers=(((1,), (1,)), ((), ())),
        preferred_element_type=jnp.float32)
    y = y + b2_ref[0, 0]

    # sigmoid = 1 / (1 + exp(-y)); exp and reciprocal both land on the
    # otherwise-idle EUP slot.
    o_ref[...] = pl.reciprocal(1.0 + jnp.exp(-y), approx=True).astype(o_ref.dtype)


def neural_network1(x, w1, b1, w2, b2, *, block_b=16384, cast_to_bf16=True,
                    min_pallas_rows=512):
    """Forward pass matching PyTorch NeuralNetwork1.

    x: [B, D_in], w1: [D_in, H], b1: [1, H], w2: [H, 1], b2: [1, 1] -> [B, 1]
    """
    B, D_in = x.shape
    H = w1.shape[1]
    out_dtype = x.dtype

    # Tiny batches are pure custom-call/DMA overhead for Pallas; let XLA fuse
    # the three ops into one small kernel instead.
    if B < min_pallas_rows:
        return jax.nn.sigmoid(
            jnp.maximum(x @ w1 + b1, 0.0) @ w2 + b2).astype(out_dtype)

    # Pre-transpose W2 to a (1, H) row so the kernel contracts it against h.
    w2_row = w2.reshape(1, H)

    if cast_to_bf16 and x.dtype == jnp.float32:
        # bf16 operands: native MXU dtype on v6e/v7x (f32 takes extra passes)
        # and half the HBM->VMEM bytes on the dominant x stream. Accumulation
        # stays f32 via preferred_element_type; post-matmul math stays f32.
        # (If x has an upstream producer, emit bf16 there so this cast fuses.)
        x = x.astype(jnp.bfloat16)
        w1 = w1.astype(jnp.bfloat16)

    # Batch tiling:
    #  * Each grid step costs ~0.35 us of fixed pipeline overhead, so tiles are
    #    large (16384 rows default). Sweeping block_b up to ~32768 is fine on
    #    v6e (32 MiB default scoped VMEM) but mind v5e's 16 MiB default scoped
    #    limit and v7x's 64 MiB physical VMEM; raise
    #    pltpu.CompilerParams(vmem_limit_bytes=...) if you push higher.
    #  * tb is a multiple of 128 in the multi-tile case so the (1, tb)
    #    lane-dense output block stores unmasked vregs.
    #  * >= 2 grid steps once B is large, so the "parallel" axis can be
    #    sharded across both v7x TensorCores.
    tb = min(block_b, max(128, (pl.cdiv(B, 2) // 128) * 128))
    if tb >= B:
        tb = B  # single block covers the whole batch
    n_tiles = pl.cdiv(B, tb)

    # No jnp.pad of x (that would be an extra full read+write of the input):
    # Pallas handles the ragged last block; all ops are row-wise, so any junk
    # rows in the padded VMEM buffer never affect valid output columns, and
    # the partial output block only writes back valid columns.
    out_row = pl.pallas_call(
        mlp_kernel,
        out_shape=jax.ShapeDtypeStruct((1, B), out_dtype),
        grid=(n_tiles,),
        in_specs=[
            pl.BlockSpec((tb, D_in), lambda i: (i, 0)),   # x: batch-tiled
            pl.BlockSpec((D_in, H), lambda i: (0, 0)),    # W1: resident
            pl.BlockSpec((1, H), lambda i: (0, 0)),       # b1: resident
            pl.BlockSpec((1, H), lambda i: (0, 0)),       # W2 row: resident
            pl.BlockSpec(memory_space=pltpu.SMEM),        # b2: SMEM scalar
        ],
        out_specs=pl.BlockSpec((1, tb), lambda i: (0, i)),
        compiler_params=pltpu.CompilerParams(
            dimension_semantics=("parallel",)),
    )(x, w1, b1, w2_row, b2)

    return out_row.reshape(B, 1)


def init_params(key, input_size, hidden_size, dtype=jnp.float32):
    """Deterministic init mimicking nn.Linear default U[-1/sqrt(fan_in), +]."""
    k1, k2, k3, k4 = jax.random.split(key, 4)
    bound1 = 1.0 / (input_size ** 0.5)
    bound2 = 1.0 / (hidden_size ** 0.5)
    # Stored as [in, out] (transpose of PyTorch's [out, in]).
    w1 = jax.random.uniform(k1, (input_size, hidden_size), dtype, -bound1, bound1)
    b1 = jax.random.uniform(k2, (1, hidden_size), dtype, -bound1, bound1)
    w2 = jax.random.uniform(k3, (hidden_size, 1), dtype, -bound2, bound2)
    b2 = jax.random.uniform(k4, (1, 1), dtype, -bound2, bound2)
    return w1, b1, w2, b2


if __name__ == "__main__":
    key = jax.random.PRNGKey(0)
    k_x, k_p, k_xl = jax.random.split(key, 3)

    input_size, hidden_size = 16, 32
    w1, b1, w2, b2 = init_params(k_p, input_size, hidden_size)

    # 1) Demo-sized batch (8 rows): dispatches to the fused-XLA fallback path.
    x_small = jax.random.normal(k_x, (8, input_size), jnp.float32)
    out_small = jax.block_until_ready(neural_network1(x_small, w1, b1, w2, b2))
    ref_small = jax.nn.sigmoid(jnp.maximum(x_small @ w1 + b1, 0.0) @ w2 + b2)
    assert out_small.shape == (8, 1)
    assert jnp.allclose(out_small, ref_small, atol=1e-5), "small-batch mismatch"

    # 2) Larger ragged batch: exercises the Pallas kernel (3 batch tiles,
    #    partial last block, lane-dense output, bf16 operands).
    batch = 1000
    x = jax.random.normal(k_xl, (batch, input_size), jnp.float32)
    out = jax.block_until_ready(neural_network1(x, w1, b1, w2, b2))

    # Reference on the same bf16-quantized operands (the kernel casts x/W1 by
    # default); the remaining delta is the approximate EUP reciprocal in sigmoid.
    xq = x.astype(jnp.bfloat16).astype(jnp.float32)
    w1q = w1.astype(jnp.bfloat16).astype(jnp.float32)
    ref = jax.nn.sigmoid(jnp.maximum(xq @ w1q + b1, 0.0) @ w2 + b2)
    assert out.shape == (batch, 1)
    assert jnp.allclose(out, ref, atol=2e-3), "kernel mismatch vs reference"

    print("KERNEL_OK")
</pallas_src>

<mosaic_0001>
module attributes {stable_mosaic.version = 11 : i64} {
  func.func @mlp_kernel(%arg0: i32, %arg1: memref<384x16xbf16, #tpu.memory_space<vmem>>, %arg2: memref<16x32xbf16, #tpu.memory_space<vmem>>, %arg3: memref<1x32xf32, #tpu.memory_space<vmem>>, %arg4: memref<1x32xf32, #tpu.memory_space<vmem>>, %arg5: memref<1x1xf32, #tpu.memory_space<smem>>, %arg6: memref<1x384xf32, #tpu.memory_space<vmem>>) attributes {dimension_semantics = [#tpu.dimension_semantics<parallel>], iteration_bounds = array<i64: 3>, scalar_prefetch = 0 : i64, scratch_operands = 0 : i64, tpu.core_type = #tpu.core_type<tc>, window_params = [{transform_indices = @transform_0, window_bounds = array<i64: 384, 16>}, {pipeline_mode = #tpu.pipeline_mode<synchronous>, transform_indices = @transform_1, window_bounds = array<i64: 16, 32>}, {pipeline_mode = #tpu.pipeline_mode<synchronous>, transform_indices = @transform_2, window_bounds = array<i64: 1, 32>}, {pipeline_mode = #tpu.pipeline_mode<synchronous>, transform_indices = @transform_3, window_bounds = array<i64: 1, 32>}, {transform_indices = @transform_4, window_bounds = array<i64: 1, 1>}, {transform_indices = @transform_5, window_bounds = array<i64: 1, 384>}]} {
    %c0 = arith.constant 0 : index
    %c0_0 = arith.constant 0 : index
    %0 = vector.load %arg1[%c0, %c0_0] : memref<384x16xbf16, #tpu.memory_space<vmem>>, vector<384x16xbf16>
    %c0_1 = arith.constant 0 : index
    %c0_2 = arith.constant 0 : index
    %1 = vector.load %arg2[%c0_1, %c0_2] : memref<16x32xbf16, #tpu.memory_space<vmem>>, vector<16x32xbf16>
    %cst = arith.constant dense<0.000000e+00> : vector<384x32xf32>
    %2 = tpu.matmul %0, %1, %cst {dimension_numbers = #tpu.dot_dimension_numbers<[1], [0], [0], [1], [0, 0, 1, 1], [], []>} : vector<384x16xbf16>, vector<16x32xbf16>, vector<384x32xf32> -> vector<384x32xf32>
    %c0_3 = arith.constant 0 : index
    %c0_4 = arith.constant 0 : index
    %3 = vector.load %arg3[%c0_3, %c0_4] : memref<1x32xf32, #tpu.memory_space<vmem>>, vector<1x32xf32>
    %4 = vector.broadcast %3 : vector<1x32xf32> to vector<384x32xf32>
    %5 = arith.addf %2, %4 : vector<384x32xf32>
    %cst_5 = arith.constant 0.000000e+00 : f32
    %6 = vector.broadcast %cst_5 : f32 to vector<384x32xf32>
    %7 = arith.maximumf %5, %6 : vector<384x32xf32>
    %c0_6 = arith.constant 0 : index
    %c0_7 = arith.constant 0 : index
    %8 = vector.load %arg4[%c0_6, %c0_7] : memref<1x32xf32, #tpu.memory_space<vmem>>, vector<1x32xf32>
    %cst_8 = arith.constant dense<0.000000e+00> : vector<1x384xf32>
    %9 = tpu.matmul %8, %7, %cst_8 {dimension_numbers = #tpu.dot_dimension_numbers<[1], [1], [0], [0], [0, 0, 1, 0], [], []>} : vector<1x32xf32>, vector<384x32xf32>, vector<1x384xf32> -> vector<1x384xf32>
    %c0_9 = arith.constant 0 : index
    %c0_10 = arith.constant 0 : index
    %10 = memref.load %arg5[%c0_9, %c0_10] : memref<1x1xf32, #tpu.memory_space<smem>>
    %11 = vector.broadcast %10 : f32 to vector<1x384xf32>
    %12 = arith.addf %9, %11 : vector<1x384xf32>
    %cst_11 = arith.constant 0.000000e+00 : f32
    %13 = vector.broadcast %cst_11 : f32 to vector<1x384xf32>
    %14 = arith.subf %13, %12 : vector<1x384xf32>
    %15 = math.exp %14 : vector<1x384xf32>
    %cst_12 = arith.constant 1.000000e+00 : f32
    %16 = vector.broadcast %cst_12 : f32 to vector<1x384xf32>
    %17 = arith.addf %16, %15 : vector<1x384xf32>
    %18 = tpu.reciprocal %17 {approx = true} : vector<1x384xf32> -> vector<1x384xf32>
    %c0_13 = arith.constant 0 : index
    %c0_14 = arith.constant 0 : index
    %19 = vector.load %arg6[%c0_13, %c0_14] : memref<1x384xf32, #tpu.memory_space<vmem>>, vector<1x384xf32>
    tpu.vector_store %arg6[%c0_13, %c0_14], %18 {strides = array<i32>} : memref<1x384xf32, #tpu.memory_space<vmem>>, vector<1x384xf32>,
    return
  }
  func.func @transform_0(%arg0: i32) -> (i32, i32) {
    %c0_i32 = arith.constant 0 : i32
    %c0_i32_0 = arith.constant 0 : i32
    return %arg0, %c0_i32 : i32, i32
  }
  func.func @transform_1(%arg0: i32) -> (i32, i32) {
    %c0_i32 = arith.constant 0 : i32
    %c0_i32_0 = arith.constant 0 : i32
    %c0_i32_1 = arith.constant 0 : i32
    return %c0_i32, %c0_i32_0 : i32, i32
  }
  func.func @transform_2(%arg0: i32) -> (i32, i32) {
    %c0_i32 = arith.constant 0 : i32
    %c0_i32_0 = arith.constant 0 : i32
    %c0_i32_1 = arith.constant 0 : i32
    return %c0_i32, %c0_i32_0 : i32, i32
  }
  func.func @transform_3(%arg0: i32) -> (i32, i32) {
    %c0_i32 = arith.constant 0 : i32
    %c0_i32_0 = arith.constant 0 : i32
    %c0_i32_1 = arith.constant 0 : i32
    return %c0_i32, %c0_i32_0 : i32, i32
  }
  func.func @transform_4(%arg0: i32) -> (i32, i32) {
    %c0_i32 = arith.constant 0 : i32
    %c0_i32_0 = arith.constant 0 : i32
    %c0_i32_1 = arith.constant 0 : i32
    return %c0_i32, %c0_i32_0 : i32, i32
  }
  func.func @transform_5(%arg0: i32) -> (i32, i32) {
    %c0_i32 = arith.constant 0 : i32
    %c0_i32_0 = arith.constant 0 : i32
    return %c0_i32, %arg0 : i32, i32
  }
}

</mosaic_0001>

<bundles_post_ra>
// kernel: tpu_custom_call.1
= control target key start
LH: loop header
LB: loop body
LE: loop exit
PB: predicated region body
PF: predicated region fallthrough
CT: control target
= control target key end

     0   :  { %s2059_s0 = inlined_call_operand.vmem [shape: bf16[1000,16], index: 0, kind: input, shape index: {}]   ;;  %s2060_s1 = inlined_call_operand.vmem [shape: bf16[16,32], index: 1, kind: input, shape index: {}]   ;;  %s2061_s2 = inlined_call_operand.vmem [shape: f32[1,32], index: 2, kind: input, shape index: {}]   ;;  %s2062_s3 = inlined_call_operand.vmem [shape: f32[1,32], index: 3, kind: input, shape index: {}]   ;;  %s2063_s4 = inlined_call_operand.<no memory space> [shape: f32[1,1], index: 4, kind: input, shape index: {}]   ;;  %s2064_s5 = inlined_call_operand.hbm [shape: f32[1,1000], index: 5, kind: output, shape index: {}]  }
   0x1   :  { %10 = sst [smem:[#allocation2]] %s2063_s4 }
   0x2   :  { %11 = vsyncpa [#allocation4], 0 }
   0x3   :  { %13 = vsyncpa [#allocation4 + $0x1], 0  ;;  %s1735_s20 = smov 0   ;;  %s1737_s21 = smov 0  }
   0x4   :  { %s1739_s22 = smov 0   ;;  %s1741_s23 = smov 0  }
   0x5 LB: > { %s1756_s4 = sadd.s32 4294967295, %s1695_s23   ;;  %s1199_s24 = sadd.s32 4294967294, %s1695_s23   ;;  %s1695_s23 = sphi %s1741_s23, %s2072_s23   ;;  %s1691_s22 = sphi %s1739_s22, %s2071_s22   ;;  %s1687_s21 = sphi %s1737_s21, %s2070_s21   ;;  %s1683_s20 = sphi %s1735_s20, %s2069_s20  }
   0x6   : > { %s1760_s25 = sadd.s32 1, %s1695_s23   ;;  %s136_s26 = sadd.s32 1, %s1691_s22 }
   0x7   : > { %s133_s27 = ssub.s32 %s1695_s23, %s1760_s25  ;;  %p146_p0 = scmp.ne.s32.totalorder %s1691_s22, %s1687_s21 }
   0x8   : > { %p134_p1 = scmp.eq.s32.totalorder %s133_s27, 0  ;;  %p147_p2 = scmp.eq.s32.totalorder %s1756_s4, 2 }
   0x9   : > { %p152_p3 = scmp.ne.s32.totalorder %s1687_s21, %s1683_s20  ;;  %p153_p4 = scmp.eq.s32.totalorder %s1199_s24, 2 }
   0xa   : > { %s1771_s28 = scalar_select %p134_p1, %s1691_s22, %s136_s26  }
   0xb   : > { %p1773_p5 = por %p147_p2, %p146_p0  ;;  %p1777_p6 = por %p153_p4, %p152_p3 }
   0xc   : > { %p1202_p7 = scmp.ge.s32.totalorder %s1695_s23, 1  ;;  %p200_p8 = scmp.lt.s32.totalorder %s1695_s23, 4 }
   0xe   : > { %p201_p9 = pnand %p1202_p7, %p200_p8 }
   0xf   : > { %v1596_v0 = vld [vmem:[%s2060_s1] sm:$0xff] (!%p201_p9)   ;;  %s1787_s8 = smul.u32 (!%p201_p9), 48, %s1756_s4  ;;  %vm435_vm0 = vcmask (!%p201_p9), 130048   ;;  %v1697_v25 = vmov (!%p201_p9), 0.0|0.0   ;;  %vm784_vm1 = vcmask (!%p201_p9), 261120   ;;  %vm1698_vm2 = vmmov (!%p201_p9), 0  }
  0x10   : > { %204 = sbr.rel (%p201_p9) target bundleno = 625 (0x271), region = 40  ;;  %1386 = vmatprep.subr.bf16.mxu0 (!%p201_p9), %v1596_v0  ;;  %1551 = vmatprep.subr.bf16.mxu1 (!%p201_p9), %v1596_v0  ;;  %v1848_v26 = vld [vmem:[%s2062_s3] sm:$0x1] (!%p201_p9)  ;;  %v1699_v27 = vmov (!%p201_p9), 0.0   ;;  %vm1877_vm3 = vmpackc.low (!%p201_p9), %vm784_vm1, %vm784_vm1  ;;  %s229_s18 = sand.u32 (!%p201_p9), 1, %s1687_s21  }
  0x11   : > { %p237_p10 = scmp.lt.s32.totalorder (!%p201_p9), %s1787_s8, 124  ;;  %1387 = vmatpush3.bf16.msra.mxu0 (!%p201_p9), %v1596_v0  ;;  %1552 = vmatpush3.bf16.msra.mxu1 (!%p201_p9), %v1596_v0  ;;  %v1855_v28 = vld [vmem:[%s2061_s2] ss:$0 sm:$0xff] (!%p201_p9)  ;;  %s782_s19 = sld [smem:[#allocation2]] (!%p201_p9) }
  0x12   : > { %1519 = vmatprep.subr.bf16.mxu0 (!%p201_p9), %v1697_v25  ;;  %s1553_s24 = smul.u32 (!%p201_p9), 3, %s229_s18  ;;  %s2005_s27 = scalar_lea.sflag (!%p201_p9), [#allocation4], %s229_s18 }
  0x14   : > { %s231_s26 = scalar_lea.vmem (!%p201_p9), [#allocation3], %s1553_s24 }
  0x17   : > { %s238_s9 = scalar_select %p237_p10, %s1787_s8, 124 }
  0x18   : > { %s1128_s6 = smul.u32 (%p1773_p5), 3, %s1756_s4 }
  0x19   : > { %s1203_s10 = sshll.u32 %s238_s9, 2 }
  0x1a   : > { %s1794_s13 = scalar_lea.vmem %s2059_s0, %s1203_s10  ;;  %s1129_s7 = ssub.s32 (%p1773_p5), 8, %s1128_s6 }
  0x1b   : > { %v1597_v1 = vld [vmem:[%s1794_s13] sm:$0xff]   ;;  %v1598_v2 = vld [vmem:[%s1794_s13 + $0x8] sm:$0xff]   ;;  %v1599_v3 = vld [vmem:[%s1794_s13 + $0x10] sm:$0xff]   ;;  %p1130_p11 = scmp.lt.s32.totalorder (%p1773_p5), %s1129_s7, 3 }
  0x1c   : > { %1388 = vmatprep.mubr.msk.bf16.mxu0 %vm435_vm0, %v1597_v1  ;;  %v1600_v4 = vld [vmem:[%s1794_s13 + $0x18] sm:$0xff]   ;;  %v1604_v5 = vld [vmem:[%s1794_s13 + $0x80] sm:$0xff]   ;;  %v1606_v7 = vld [vmem:[%s1794_s13 + $0x88] sm:$0xff]  }
  0x1d   : > { %1389 = vmatmul.mubr.msk.bf16.vlgmr.msra.gmra.mrb[0].mxu0 %vm435_vm0, %v1598_v2  ;;  %v1601_v6 = vld [vmem:[%s1794_s13 + $0x20] sm:$0xff]   ;;  %1420 = vmatprep.mubr.msk.bf16.mxu1 %vm435_vm0, %v1604_v5  ;;  %v1609_v8 = vld [vmem:[%s1794_s13 + $0x90] sm:$0xff]   ;;  %v1602_v9 = vld [vmem:[%s1794_s13 + $0x28] sm:$0xff]  }
  0x1e   : > { %1392 = vmatprep.mubr.msk.bf16.mxu0 %vm435_vm0, %v1599_v3  ;;  %1421 = vmatmul.mubr.msk.bf16.vlgmr.msra.gmra.mrb[0].mxu1 %vm435_vm0, %v1606_v7  ;;  %v1603_v10 = vld [vmem:[%s1794_s13 + $0x30] sm:$0xff]   ;;  %v1610_v11 = vld [vmem:[%s1794_s13 + $0x98] sm:$0xff]   ;;  %v1613_v12 = vld [vmem:[%s1794_s13 + $0xa0] sm:$0xff]  }
  0x1f   : > { %1424 = vmatprep.mubr.msk.bf16.mxu1 %vm435_vm0, %v1609_v8  ;;  %v1605_v13 = vld [vmem:[%s1794_s13 + $0x38] sm:$0xff]   ;;  %v1614_v14 = vld [vmem:[%s1794_s13 + $0xa8] sm:$0xff]   ;;  %v1607_v15 = vld [vmem:[%s1794_s13 + $0x40] sm:$0xff]  }
  0x20   : > { %v1617_v16 = vld [vmem:[%s1794_s13 + $0xb0] sm:$0xff]   ;;  %v1608_v17 = vld [vmem:[%s1794_s13 + $0x48] sm:$0xff]   ;;  %v1618_v18 = vld [vmem:[%s1794_s13 + $0xb8] sm:$0xff]  }
  0x21   : > { %v1611_v19 = vld [vmem:[%s1794_s13 + $0x50] sm:$0xff]   ;;  %v1612_v20 = vld [vmem:[%s1794_s13 + $0x58] sm:$0xff]   ;;  %v1615_v21 = vld [vmem:[%s1794_s13 + $0x60] sm:$0xff]  }
  0x22   : > { %v1616_v22 = vld [vmem:[%s1794_s13 + $0x68] sm:$0xff]   ;;  %v1619_v23 = vld [vmem:[%s1794_s13 + $0x70] sm:$0xff]   ;;  %v1620_v24 = vld [vmem:[%s1794_s13 + $0x78] sm:$0xff]  }
  0x25   : > { %1393 = vmatmul.mubr.msk.bf16.gmra.mrb[4].mxu0 %vm435_vm0, %v1600_v4 }
  0x26   : > { %1396 = vmatprep.mubr.msk.bf16.mxu0 %vm435_vm0, %v1601_v6  ;;  %1425 = vmatmul.mubr.msk.bf16.gmra.mrb[4].mxu1 %vm435_vm0, %v1610_v11 }
  0x27   : > { %1428 = vmatprep.mubr.msk.bf16.mxu1 %vm435_vm0, %v1613_v12 }
  0x2d   : > { %1397 = vmatmul.mubr.msk.bf16.gmra.mrb[8].mxu0 %vm435_vm0, %v1602_v9 }
  0x2e   : > { %1400 = vmatprep.mubr.msk.bf16.mxu0 %vm435_vm0, %v1603_v10  ;;  %1429 = vmatmul.mubr.msk.bf16.gmra.mrb[8].mxu1 %vm435_vm0, %v1614_v14 }
  0x2f   : > { %1432 = vmatprep.mubr.msk.bf16.mxu1 %vm435_vm0, %v1617_v16 }
  0x35   : > { %1401 = vmatmul.mubr.msk.bf16.gmra.mrb[12].mxu0 %vm435_vm0, %v1605_v13 }
  0x36   : > { %1404 = vmatprep.mubr.msk.bf16.mxu0 %vm435_vm0, %v1607_v15  ;;  %1433 = vmatmul.mubr.msk.bf16.gmra.mrb[12].mxu1 %vm435_vm0, %v1618_v18 }
  0x37   : > { %1367 = vmatprep.mubr.msk.f32.mxu1 %vm784_vm1, %v1848_v26 }
  0x3d   : > { %1405 = vmatmul.mubr.msk.bf16.gmra.mrb[16].mxu0 %vm435_vm0, %v1608_v17 }
  0x3e   : > { %1408 = vmatprep.mubr.msk.bf16.mxu0 %vm435_vm0, %v1611_v19 }
  0x45   : > { %1409 = vmatmul.mubr.msk.bf16.gmra.mrb[20].mxu0 %vm435_vm0, %v1612_v20 }
  0x46   : > { %1412 = vmatprep.mubr.msk.bf16.mxu0 %vm435_vm0, %v1615_v21 }
  0x4d   : > { %1413 = vmatmul.mubr.msk.bf16.gmra.mrb[24].mxu0 %vm435_vm0, %v1616_v22 }
  0x4e   : > { %1416 = vmatprep.mubr.msk.bf16.mxu0 %vm435_vm0, %v1619_v23 }
  0x55   : > { %1417 = vmatmul.mubr.msk.bf16.gmra.mrb[28].mxu0 %vm435_vm0, %v1620_v24 }
  0x56   : > { %1468 = vmatprep.mubr.msk.f32.mxu0 %vm1698_vm2, %v1699_v27 }
  0xf0   : > { %v1390_v29 = vpop.f32.mrb[0].mxu0 }
  0xf1   : > { %v551_v30 = vadd.f32 %v1390_v29, %v1855_v28  ;;  %v542_v31 = vpop.f32.mrb[1].mxu0  ;;  %v1422_v44 = vpop.f32.mrb[0].mxu1 }
  0xf2   : > { %v543_v32 = vadd.f32 %v1855_v28, %v542_v31  ;;  %v1391_v33 = vpop.f32.mrb[2].mxu0  ;;  %v679_v47 = vadd.f32 %v1422_v44, %v1855_v28  ;;  %v670_v48 = vpop.f32.mrb[1].mxu1 }
  0xf3   : > { %v554_v34 = vadd.f32 %v1391_v33, %v1855_v28  ;;  %v545_v35 = vpop.f32.mrb[3].mxu0  ;;  %v735_v37 = vmax.f32 %v551_v30, 0.0  ;;  %v671_v51 = vadd.f32 %v1855_v28, %v670_v48  ;;  %v1423_v52 = vpop.f32.mrb[2].mxu1 }
  0xf4   : > { %v546_v36 = vadd.f32 %v1855_v28, %v545_v35  ;;  %v733_v39 = vmax.f32 %v543_v32, 0.0  ;;  %v767_v55 = vmax.f32 %v679_v47, 0.0  ;;  %v682_v56 = vadd.f32 %v1423_v52, %v1855_v28  ;;  %v673_v57 = vpop.f32.mrb[3].mxu1 }
  0xf5   : > { %v736_v38 = vmax.f32 %v554_v34, 0.0  ;;  %v765_v59 = vmax.f32 %v671_v51, 0.0  ;;  %v674_v60 = vadd.f32 %v1855_v28, %v673_v57 }
  0xf6   : > { %v734_v40 = vmax.f32 %v546_v36, 0.0  ;;  %v768_v63 = vmax.f32 %v682_v56, 0.0 }
  0xf7   : > { %v1861_v41 = vpack.c.bf16 %v736_v38, %v735_v37  ;;  %v766_v2 = vmax.f32 %v674_v60, 0.0 }
  0xf8   : > { %v1863_v42 = vpack.c.bf16 %v734_v40, %v733_v39  ;;  %v1394_v43 = vpop.f32.mrb[4].mxu0  ;;  %v1524_v4 = vpack.c.bf16 %v768_v63, %v767_v55 }
  0xf9   : > { %v567_v45 = vadd.f32 %v1394_v43, %v1855_v28  ;;  %v558_v46 = vpop.f32.mrb[5].mxu0  ;;  %v1520_v8 = vpack.c.bf16 %v766_v2, %v765_v59  ;;  %v1426_v9 = vpop.f32.mrb[4].mxu1 }
  0xfa   : > { %v559_v49 = vadd.f32 %v1855_v28, %v558_v46  ;;  %v1395_v50 = vpop.f32.mrb[6].mxu0  ;;  %v695_v12 = vadd.f32 %v1426_v9, %v1855_v28  ;;  %v686_v13 = vpop.f32.mrb[5].mxu1 }
  0xfb   : > { %v570_v53 = vadd.f32 %v1395_v50, %v1855_v28  ;;  %v561_v54 = vpop.f32.mrb[7].mxu0  ;;  %v739_v61 = vmax.f32 %v567_v45, 0.0  ;;  %1522 = vmatpush3.bf16.xpose.msk.msra.mxu0 %vm1877_vm3, %v1520_v8  ;;  %v687_v16 = vadd.f32 %v1855_v28, %v686_v13  ;;  %v1427_v17 = vpop.f32.mrb[6].mxu1 }
  0xfc   : > { %v562_v58 = vadd.f32 %v1855_v28, %v561_v54  ;;  %v737_v0 = vmax.f32 %v559_v49, 0.0  ;;  %v771_v20 = vmax.f32 %v695_v12, 0.0  ;;  %1523 = vmatprep.subr.bf16.mxu0 %v1697_v25  ;;  %v698_v21 = vadd.f32 %v1427_v17, %v1855_v28  ;;  %v689_v22 = vpop.f32.mrb[7].mxu1 }
  0xfd   : > { %v740_v62 = vmax.f32 %v570_v53, 0.0  ;;  %v769_v24 = vmax.f32 %v687_v16, 0.0  ;;  %v690_v27 = vadd.f32 %v1855_v28, %v689_v22 }
  0xfe   : > { %v738_v1 = vmax.f32 %v562_v58, 0.0  ;;  %v772_v31 = vmax.f32 %v698_v21, 0.0 }
  0xff   : > { %v1873_v3 = vpack.c.bf16 %v740_v62, %v739_v61  ;;  %v770_v34 = vmax.f32 %v690_v27, 0.0 }
 0x100   : > { %v1881_v6 = vpack.c.bf16 %v738_v1, %v737_v0  ;;  %v1398_v7 = vpop.f32.mrb[8].mxu0  ;;  %v1896_v36 = vpack.c.bf16 %v772_v31, %v771_v20 }
 0x101   : > { %v583_v10 = vadd.f32 %v1398_v7, %v1855_v28  ;;  %v574_v11 = vpop.f32.mrb[9].mxu0  ;;  %v1528_v39 = vpack.c.bf16 %v770_v34, %v769_v24  ;;  %v1430_v40 = vpop.f32.mrb[8].mxu1 }
 0x102   : > { %v575_v14 = vadd.f32 %v1855_v28, %v574_v11  ;;  %v1399_v15 = vpop.f32.mrb[10].mxu0  ;;  %v711_v45 = vadd.f32 %v1430_v40, %v1855_v28  ;;  %v702_v46 = vpop.f32.mrb[9].mxu1 }
 0x103   : > { %v586_v18 = vadd.f32 %v1399_v15, %v1855_v28  ;;  %v577_v19 = vpop.f32.mrb[11].mxu0  ;;  %v743_v29 = vmax.f32 %v583_v10, 0.0  ;;  %1526 = vmatpush3.bf16.xpose.msk.msra.mxu0 %vm1877_vm3, %v1524_v4  ;;  %v703_v49 = vadd.f32 %v1855_v28, %v702_v46  ;;  %v1431_v50 = vpop.f32.mrb[10].mxu1 }
 0x104   : > { %v578_v23 = vadd.f32 %v1855_v28, %v577_v19  ;;  %v741_v32 = vmax.f32 %v575_v14, 0.0  ;;  %1527 = vmatprep.subr.bf16.mxu0 %v1697_v25  ;;  %v775_v53 = vmax.f32 %v711_v45, 0.0  ;;  %v714_v54 = vadd.f32 %v1431_v50, %v1855_v28  ;;  %v705_v55 = vpop.f32.mrb[11].mxu1 }
 0x105   : > { %v744_v30 = vmax.f32 %v586_v18, 0.0  ;;  %v773_v57 = vmax.f32 %v703_v49, 0.0  ;;  %v706_v58 = vadd.f32 %v1855_v28, %v705_v55 }
 0x106   : > { %v742_v33 = vmax.f32 %v578_v23, 0.0  ;;  %v776_v61 = vmax.f32 %v714_v54, 0.0 }
 0x107   : > { %v1894_v35 = vpack.c.bf16 %v744_v30, %v743_v29  ;;  %v774_v0 = vmax.f32 %v706_v58, 0.0 }
 0x108   : > { %v1898_v37 = vpack.c.bf16 %v742_v33, %v741_v32  ;;  %v1402_v38 = vpop.f32.mrb[12].mxu0  ;;  %v1913_v2 = vpack.c.bf16 %v776_v61, %v775_v53 }
 0x109   : > { %v599_v43 = vadd.f32 %v1402_v38, %v1855_v28  ;;  %v590_v44 = vpop.f32.mrb[13].mxu0  ;;  %v1536_v8 = vpack.c.bf16 %v774_v0, %v773_v57  ;;  %v1434_v9 = vpop.f32.mrb[12].mxu1 }
 0x10a   : > { %v591_v47 = vadd.f32 %v1855_v28, %v590_v44  ;;  %v1403_v48 = vpop.f32.mrb[14].mxu0  ;;  %v727_v12 = vadd.f32 %v1434_v9, %v1855_v28  ;;  %v718_v13 = vpop.f32.mrb[13].mxu1 }
 0x10b   : > { %v602_v51 = vadd.f32 %v1403_v48, %v1855_v28  ;;  %v593_v52 = vpop.f32.mrb[15].mxu0  ;;  %v747_v59 = vmax.f32 %v599_v43, 0.0  ;;  %1530 = vmatpush3.bf16.xpose.msk.msra.mxu0 %vm1877_vm3, %v1528_v39  ;;  %v719_v16 = vadd.f32 %v1855_v28, %v718_v13  ;;  %v1435_v17 = vpop.f32.mrb[14].mxu1 }
 0x10c   : > { %v594_v56 = vadd.f32 %v1855_v28, %v593_v52  ;;  %v745_v62 = vmax.f32 %v591_v47, 0.0  ;;  %1531 = vmatprep.subr.bf16.mxu0 %v1697_v25  ;;  %v779_v20 = vmax.f32 %v727_v12, 0.0  ;;  %v730_v21 = vadd.f32 %v1435_v17, %v1855_v28  ;;  %v721_v22 = vpop.f32.mrb[15].mxu1 }
 0x10d   : > { %v748_v60 = vmax.f32 %v602_v51, 0.0  ;;  %v777_v24 = vmax.f32 %v719_v16, 0.0  ;;  %v722_v27 = vadd.f32 %v1855_v28, %v721_v22 }
 0x10e   : > { %v746_v63 = vmax.f32 %v594_v56, 0.0  ;;  %v780_v31 = vmax.f32 %v730_v21, 0.0 }
 0x10f   : > { %v1911_v1 = vpack.c.bf16 %v748_v60, %v747_v59  ;;  %v778_v34 = vmax.f32 %v722_v27, 0.0 }
 0x110   : > { %v1915_v4 = vpack.c.bf16 %v746_v63, %v745_v62  ;;  %v1406_v7 = vpop.f32.mrb[16].mxu0  ;;  %v1548_v39 = vpack.c.bf16 %v780_v31, %v779_v20 }
 0x111   : > { %v615_v10 = vadd.f32 %v1406_v7, %v1855_v28  ;;  %v606_v11 = vpop.f32.mrb[17].mxu0  ;;  %v1544_v44 = vpack.c.bf16 %v778_v34, %v777_v24 }
 0x112   : > { %v607_v14 = vadd.f32 %v1855_v28, %v606_v11  ;;  %v1407_v15 = vpop.f32.mrb[18].mxu0 }
 0x113   : > { %v618_v18 = vadd.f32 %v1407_v15, %v1855_v28  ;;  %v609_v19 = vpop.f32.mrb[19].mxu0  ;;  %v751_v29 = vmax.f32 %v615_v10, 0.0  ;;  %1534 = vmatpush3.bf16.xpose.msk.msra.mxu0 %vm1877_vm3, %v1896_v36 }
 0x114   : > { %v610_v23 = vadd.f32 %v1855_v28, %v609_v19  ;;  %v749_v32 = vmax.f32 %v607_v14, 0.0  ;;  %1535 = vmatprep.subr.bf16.mxu0 %v1697_v25 }
 0x115   : > { %v752_v30 = vmax.f32 %v618_v18, 0.0 }
 0x116   : > { %v750_v33 = vmax.f32 %v610_v23, 0.0 }
 0x117   : > { %v1477_v38 = vpack.c.bf16 %v752_v30, %v751_v29 }
 0x118   : > { %v1471_v40 = vpack.c.bf16 %v750_v33, %v749_v32  ;;  %v1410_v43 = vpop.f32.mrb[20].mxu0 }
 0x119   : > { %v631_v45 = vadd.f32 %v1410_v43, %v1855_v28  ;;  %v622_v46 = vpop.f32.mrb[21].mxu0 }
 0x11a   : > { %1473 = vmatprep.subr.msk.bf16.mxu1 %vm1877_vm3, %v1471_v40  ;;  %v623_v47 = vadd.f32 %v1855_v28, %v622_v46  ;;  %v1411_v48 = vpop.f32.mrb[22].mxu0  ;;  %v1700_v40 = vmov 1966171168  }
 0x11b   : > { %1476 = vmatpush3.bf16.xpose.msk.msra.mxu1 %vm1877_vm3, %v1863_v42  ;;  %v755_v49 = vmax.f32 %v631_v45, 0.0  ;;  %v634_v50 = vadd.f32 %v1411_v48, %v1855_v28  ;;  %v625_v51 = vpop.f32.mrb[23].mxu0  ;;  %1538 = vmatpush3.bf16.xpose.msk.msra.mxu0 %vm1877_vm3, %v1536_v8  ;;  %v1093_v43 = vunpack.c.l.s4 %v1700_v40 }
 0x11c   : > { %1479 = vmatprep.subr.msk.bf16.mxu1 %vm1877_vm3, %v1477_v38  ;;  %v753_v52 = vmax.f32 %v623_v47, 0.0  ;;  %v626_v53 = vadd.f32 %v1855_v28, %v625_v51  ;;  %1539 = vmatprep.subr.bf16.mxu0 %v1697_v25 }
 0x11d   : > { %v756_v54 = vmax.f32 %v634_v50, 0.0  ;;  %v1094_v45 = vunpack.c.0.s8 %v1093_v43 }
 0x11e   : > { %v754_v55 = vmax.f32 %v626_v53, 0.0 }
 0x11f   : > { %v1489_v56 = vpack.c.bf16 %v756_v54, %v755_v49 }
 0x120   : > { %v1483_v36 = vpack.c.bf16 %v754_v55, %v753_v52  ;;  %v1414_v57 = vpop.f32.mrb[24].mxu0 }
 0x121   : > { %v647_v58 = vadd.f32 %v1414_v57, %v1855_v28  ;;  %v638_v42 = vpop.f32.mrb[25].mxu0 }
 0x122   : > { %v639_v59 = vadd.f32 %v1855_v28, %v638_v42  ;;  %v1415_v60 = vpop.f32.mrb[26].mxu0 }
 0x123   : > { %1482 = vmatpush3.bf16.xpose.msk.msra.mxu1 %vm1877_vm3, %v1861_v41  ;;  %v759_v61 = vmax.f32 %v647_v58, 0.0  ;;  %v650_v62 = vadd.f32 %v1415_v60, %v1855_v28  ;;  %v641_v63 = vpop.f32.mrb[27].mxu0  ;;  %1542 = vmatpush3.bf16.xpose.msk.msra.mxu0 %vm1877_vm3, %v1913_v2 }
 0x124   : > { %1485 = vmatprep.subr.msk.bf16.mxu1 %vm1877_vm3, %v1483_v36  ;;  %v757_v0 = vmax.f32 %v639_v59, 0.0  ;;  %v642_v7 = vadd.f32 %v1855_v28, %v641_v63  ;;  %1543 = vmatprep.subr.bf16.mxu0 %v1697_v25 }
 0x125   : > { %v760_v9 = vmax.f32 %v650_v62, 0.0 }
 0x126   : > { %v758_v10 = vmax.f32 %v642_v7, 0.0 }
 0x127   : > { %v1501_v11 = vpack.c.bf16 %v760_v9, %v759_v61 }
 0x128   : > { %v1495_v8 = vpack.c.bf16 %v758_v10, %v757_v0  ;;  %v1418_v12 = vpop.f32.mrb[28].mxu0 }
 0x129   : > { %v663_v13 = vadd.f32 %v1418_v12, %v1855_v28  ;;  %v654_v41 = vpop.f32.mrb[29].mxu0 }
 0x12a   : > { %v655_v14 = vadd.f32 %v1855_v28, %v654_v41  ;;  %v1419_v15 = vpop.f32.mrb[30].mxu0 }
 0x12b   : > { %1488 = vmatpush3.bf16.xpose.msk.msra.mxu1 %vm1877_vm3, %v1881_v6  ;;  %v763_v16 = vmax.f32 %v663_v13, 0.0  ;;  %v666_v17 = vadd.f32 %v1419_v15, %v1855_v28  ;;  %v657_v18 = vpop.f32.mrb[31].mxu0  ;;  %1546 = vmatpush3.bf16.xpose.msk.msra.mxu0 %vm1877_vm3, %v1544_v44  ;;  %v1095_v44 = vlaneseq }
 0x12c   : > { %1491 = vmatprep.subr.msk.bf16.mxu1 %vm1877_vm3, %v1489_v56  ;;  %v761_v19 = vmax.f32 %v655_v14, 0.0  ;;  %v658_v20 = vadd.f32 %v1855_v28, %v657_v18  ;;  %1547 = vmatprep.subr.bf16.mxu0 %v1697_v25 }
 0x12d   : > { %v764_v2 = vmax.f32 %v666_v17, 0.0  ;;  %v1096_v46 = vshrl.u32 %v1095_v44, 7  ;;  %vm1117_vm4 = vcmp.lt.s32.totalorder %v1095_v44, 384 }
 0x12e   : > { %v762_v21 = vmax.f32 %v658_v20, 0.0 }
 0x12f   : > { %v1513_v22 = vpack.c.bf16 %v764_v2, %v763_v16  ;;  %v1097_v47 = vsub.s32 %v1094_v45, %v1096_v46 }
 0x130   : > { %v1507_v23 = vpack.c.bf16 %v762_v21, %v761_v19 }
 0x133   : > { %1494 = vmatpush3.bf16.xpose.msk.msra.mxu1 %vm1877_vm3, %v1873_v3  ;;  %1550 = vmatpush3.bf16.xpose.msk.msra.mxu0 %vm1877_vm3, %v1548_v39  ;;  %v783_v3 = vstv %s782_s19 }
 0x134   : > { %1497 = vmatprep.subr.msk.bf16.mxu1 %vm1877_vm3, %v1495_v8 }
 0x13a   : > { %1469 = vmatmul.mubr.msk.f32.vlgmr.msra.gmra.mrb[32].mxu0 %vm784_vm1, %v1848_v26 }
 0x13b   : > { %1500 = vmatpush3.bf16.xpose.msk.msra.mxu1 %vm1877_vm3, %v1898_v37 }
 0x13c   : > { %1503 = vmatprep.subr.msk.bf16.mxu1 %vm1877_vm3, %v1501_v11 }
 0x143   : > { %1506 = vmatpush3.bf16.xpose.msk.msra.mxu1 %vm1877_vm3, %v1894_v35 }
 0x144   : > { %1509 = vmatprep.subr.msk.bf16.mxu1 %vm1877_vm3, %v1507_v23 }
 0x14b   : > { %1512 = vmatpush3.bf16.xpose.msk.msra.mxu1 %vm1877_vm3, %v1915_v4 }
 0x14c   : > { %1515 = vmatprep.subr.msk.bf16.mxu1 %vm1877_vm3, %v1513_v22 }
 0x153   : > { %1518 = vmatpush3.bf16.xpose.msk.msra.mxu1 %vm1877_vm3, %v1911_v1 }
 0x15a   : > { %1368 = vmatmul.mubr.msk.f32.vlgmr.msra.gmra.mrb[16].mxu1 %vm784_vm1, %v1848_v26 }
 0x20d   : > { %v1069_v25 = vpop.f32.mrb[32].mxu0 }
 0x20e   : > { %v1470_v28 = vpop.f32.mrb[33].mxu0  ;;  %v1070_v6 = vadd.f32 %v1069_v25, %v783_v3 }
 0x210   : > { %v1075_v35 = vsub.f32 0.0, %v1070_v6 }
 0x212   : > { %v1080_v37 = vmul.f32 1.442695, %v1075_v35 }
 0x214   : > { %1621 = vpow2.f32 %v1080_v37 }
 0x21e   : > { %v1622_v26 = vpop.eup %1621 }
 0x21f   : > { %v1084_v32 = vadd.f32 1.0, %v1622_v26 }
 0x22d   : > { %v998_v24 = vpop.f32.mrb[16].mxu1 }
 0x22e   : > { %v999_v4 = vadd.f32 %v998_v24, %v783_v3  ;;  %v1000_v27 = vpop.f32.mrb[17].mxu1 }
 0x22f   : > { %v1001_v29 = vadd.f32 %v1000_v27, %v783_v3 }
 0x230   : > { %v1073_v30 = vsub.f32 0.0, %v999_v4 }
 0x231   : > { %v1074_v31 = vsub.f32 0.0, %v1001_v29 }
 0x232   : > { %v1076_v5 = vmul.f32 1.442695, %v1073_v30 }
 0x233   : > { %v1078_v1 = vmul.f32 1.442695, %v1074_v31 }
 0x234   : > { %1623 = vpow2.f32 %v1076_v5 }
 0x235   : > { %1625 = vpow2.f32 %v1078_v1 }
 0x236   : > { %1627 = vrcp.f32 %v1084_v32 }
 0x23e   : > { %v1624_v33 = vpop.eup %1623 }
 0x23f   : > { %v1626_v34 = vpop.eup %1625  ;;  %v1082_v38 = vadd.f32 1.0, %v1624_v33 }
 0x240   : > { %v1083_v39 = vadd.f32 1.0, %v1626_v34  ;;  %v1628_v48 = vpop.eup %1627 }
 0x241   : > { %1629 = vrcp.f32 %v1082_v38  ;;  %v1105_v52 = vrot.slane %v1628_v48, %v1097_v47 }
 0x242   : > { %1631 = vrcp.f32 %v1083_v39 }
 0x24b   : > { %v1630_v49 = vpop.eup %1629 }
 0x24c   : > { %v1632_v50 = vpop.eup %1631 }
 0x24d   : > { %v1091_v51 = vcombine.low %v1630_v49, %v1632_v50 }
 0x24f   : > { %v1098_v53 = vrot.slane %v1091_v51, %v1097_v47  ;;  %1127 = sbr.rel (!%p1773_p5) target bundleno = 625 (0x271), region = 44 }
 0x251   : > { %v1106_v54 = vcombine.low %v1098_v53, %v1105_v52 }
 0x253   : > { %v1113_v55 = vrot.slane %v1106_v54, %v1097_v47 }
 0x255   : > { %1119 = vst.msk [vmem:[%s231_s26] sm:$0x7] %vm1117_vm4, %v1113_v55 }
 0x256   : > { %s2074_s7 = smov (!%p1130_p11, %s1129_s7), 3 }
 0x257   : > { %s2010_s9 = sshll.u32 %s2074_s7, 4 }
 0x258   : > { %s1134_s10 = ssub.s32 48, %s2010_s9 }
 0x259   : > { %1135 = vsyncadd %s2005_s27, %s1134_s10  ;;  %p1305_p12 = scmp.ne.s32.totalorder %s2010_s9, 0  ;;  %s2019_s29 = scalar_lea.hbm %s2064_s5, %s1787_s8 }
 0x25a   : > { %s1140_s13 = sshll.u32 %s231_s26, 4  ;;  %s1701_s14 = smov [#allocation3]   ;;  %s1141_s13 = int_to_ptr.vmem [resolvable:$true] %s1140_s13 }
 0x25b   : > { %s1633_s4 = scalar_lea.vmem %s1141_s13, %s2010_s9  ;;  %s1637_s15 = sshll.u32 %s1701_s14, 4  ;;  %s1638_s15 = int_to_ptr.vmem [resolvable:$false] %s1637_s15 }
 0x25c   : > { %p1634_p13 = scmp.ne.s32.totalorder %s1141_s13, %s1633_s4  ;;  %s1639_s16 = scalar_lea.vmem %s1638_s15, 96 }
 0x25d   : > { %p1640_p2 = scmp.lt.s32.totalorder %s1141_s13, %s1638_s15  ;;  %p1641_p3 = scmp.lt.s32.totalorder %s1639_s16, %s1633_s4 }
 0x25e   : > { %p1635_p0 = pnand %p1634_p13, %p1305_p12 }
 0x25f   : > { %p1642_p4 = por %p1641_p3, %p1640_p2 }
 0x260   : > { %p1636_p1 = pneg %p1635_p0 }
 0x262   : > { %p1643_p5 = pnand %p1642_p4, %p1636_p1 }
 0x264   : > { %1646 = shalt.err (!%p1643_p5)
}
 0x265   : > { %s1647_s8 = scalar_lea.hbm %s2019_s29, %s2010_s9  ;;  %s1651_s19 = scalar_lea.hbm %s2064_s5, 128 }
 0x266   : > { %p1648_p7 = scmp.ne.s32.totalorder %s2019_s29, %s1647_s8  ;;  %p1652_p10 = scmp.lt.u32.totalorder %s2019_s29, %s2064_s5 }
 0x267   : > { %p1653_p11 = scmp.lt.u32.totalorder %s1651_s19, %s1647_s8  ;;  %p1655_p0 = scmp.lt.u32.totalorder %s1647_s8, %s2019_s29 }
 0x268   : > { %p1649_p8 = pnand %p1648_p7, %p1305_p12 }
 0x269   : > { %p1654_p13 = por %p1653_p11, %p1652_p10 }
 0x26a   : > { %p1650_p9 = pneg %p1649_p8 }
 0x26b   : > { %p1656_p1 = por %p1655_p0, %p1654_p13 }
 0x26d   : > { %p1657_p2 = pnand %p1656_p1, %p1650_p9 }
 0x26f   : > { %1660 = shalt.err (!%p1657_p2)
}
 0x270   : > { %1143 = dma.vmem_to_hbm [thread:$0]  (%p1305_p12), %s1141_s13, %s2010_s9, %s2019_s29, %s2005_s27  }
 0x271 PF: > { %p1559_p3 = scmp.ge.s32.totalorder %s1695_s23, 2  ;;  %s1152_s6 = sand.u32 1, %s1683_s20  }
 0x272   : > { %s1153_s7 = scalar_lea.sflag [#allocation4], %s1152_s6 }
 0x273   : > { %p1556_p4 = pnand %p1559_p3, %p1777_p6 }
 0x275   : > { %1678 = dma.done.wait (!%p1556_p4), %s1153_s7, 48  }
 0x276   : > { %1680 = vsyncadd (!%p1556_p4), %s1153_s7, 4294967248  ;;  %p16_p5 = scmp.ge.s32.totalorder %s1760_s25, 5   ;;  %s2069_s20 = smov %s1687_s21 }
 0x277   : > { %s2070_s21 = smov %s1691_s22  ;;  %s2071_s22 = smov %s1771_s28 }
 0x278   : > { %s2072_s23 = smov %s1760_s25  ;;  %18 = sbr.rel (!%p16_p5) target bundleno = 5 (0x5), region = 75 }
 0x27f   :  { %1158 = vsyncpa [#allocation4], 1 }
 0x280   :  { %1160 = vsyncpa [#allocation4 + $0x1], 1 }

</bundles_post_ra>
